<compile_context>
chip_gen: v5e
topology: v5e:2x2
jax: 0.10.0
libtpu: 0.0.40
codegen_flags: <defaults>
</compile_context>

<pallas_src>
import functools

import jax
import jax.numpy as jnp
from jax.experimental import pallas as pl
from jax.experimental.pallas import tpu as pltpu


# ---------------------------------------------------------------------------
# Kernels
# ---------------------------------------------------------------------------
def _conv_bn_lrelu(x_ref, w_ref, b_ref, out_dtype):
    """1x1 conv (channel matmul on the MXU) + folded eval-BN bias + LeakyReLU."""
    _, TH, W, Cin = x_ref.shape
    Cw = w_ref.shape[1]
    # NOTE: this flatten is free only when W is a multiple of the sublane
    # count (8 for f32, 16 for bf16).
    # TODO(synk): pad W in the wrapper for odd spatial sizes (13x13 / 26x26
    # darknet maps) to avoid a relayout copy here.
    x = x_ref[...].reshape(TH * W, Cin)
    y = jnp.dot(x, w_ref[...], preferred_element_type=jnp.float32)
    y = y + b_ref[...]               # folded eval-BN shift (f32)
    y = jnp.maximum(y, 0.1 * y)      # LeakyReLU(negative_slope=0.1), one vmax
    return y.astype(out_dtype).reshape(TH, W, Cw)


def _upsample_kernel(x_ref, w_ref, b_ref, o_ref):
    # Unfused path: output only the 2x-upsampled conv result.
    # x_ref: (1, TH, W, Cin)
    # w_ref: (Cin, Cw)  Cw = Cout (fp32, no dup) or 2*Cout (bf16, W-duplicated)
    # b_ref: (1, Cw) in f32
    # o_ref: (1, TH, 2, W, 2*Cout)    (row, h-dup, col, w-dup*chan)
    yw = _conv_bn_lrelu(x_ref, w_ref, b_ref, o_ref.dtype)
    Cw = yw.shape[-1]
    C2 = o_ref.shape[-1]             # 2 * Cout
    if Cw == C2:
        # Weight columns were duplicated in the wrapper: the MXU already
        # produced each pixel twice along lanes (the W-direction upsample);
        # one lane-dense store per h-dup slot.
        o_ref[0, :, 0, :, :] = yw
        o_ref[0, :, 1, :, :] = yw
    else:
        # fp32 path (no weight dup, halves MXU work): realize the W-direction
        # upsample with two lane-offset stores per h-dup slot.
        Cout = Cw
        for hd in range(2):
            o_ref[0, :, hd, :, 0:Cout] = yw
            o_ref[0, :, hd, :, Cout:2 * Cout] = yw


def _upsample_concat_kernel(x_ref, w_ref, b_ref, t_ref, o_ref):
    # Fused path (Cout % 128 == 0 and Ct % 128 == 0): the kernel writes the
    # final upsample + channel-concat tensor viewed as (1, TH, 2, W, 2*(Cout+Ct)),
    # so the upsampled head never makes an extra HBM round trip.
    # t_ref: (1, TH, 2, W, 2*Ct)   route_tail viewed with split H/W factors
    yw = _conv_bn_lrelu(x_ref, w_ref, b_ref, o_ref.dtype)
    Cout = yw.shape[-1]
    Ct = t_ref.shape[-1] // 2
    C = Cout + Ct
    for hd in range(2):
        # conv/BN/LeakyReLU channels, duplicated to both w-dup pixel slots.
        o_ref[0, :, hd, :, 0:Cout] = yw
        o_ref[0, :, hd, :, C:C + Cout] = yw
        # route_tail passthrough channels (lane-aligned whole-vreg copies).
        o_ref[0, :, hd, :, Cout:C] = t_ref[0, :, hd, :, 0:Ct]
        o_ref[0, :, hd, :, C + Cout:2 * C] = t_ref[0, :, hd, :, Ct:2 * Ct]


# ---------------------------------------------------------------------------
# Tiling / generation-aware budgets
# ---------------------------------------------------------------------------
def _tpu_budget():
    """(per-step streaming target bytes, vmem_limit_bytes) per TPU generation."""
    try:
        kind = jax.devices()[0].device_kind.lower()
    except Exception:
        kind = ""
    if "v7" in kind:
        # v7x: 64 MiB VMEM per TC -> tighter cap, but 3.2 TB/s HBM wants big steps.
        return 12 << 20, 44 * 1024 * 1024
    if "v6" in kind or "v5" in kind:
        # v5e / v6e: 128 MiB physical VMEM.
        return 12 << 20, 80 * 1024 * 1024
    # Unknown backend: conservative defaults.
    return 8 << 20, 64 * 1024 * 1024


def _pick_tile_h(H, N, per_row_bytes, target_bytes, min_steps=8):
    """Largest TH dividing H whose per-step streamed bytes stay ~target, while
    keeping >= min_steps grid steps (double-buffering + v7x megacore)."""
    th = int(max(1, min(H, target_bytes // max(per_row_bytes, 1))))
    while H % th != 0:
        th -= 1
    while th > 1 and N * (H // th) < min_steps:
        th -= 1
        while H % th != 0:
            th -= 1
    return th


# ---------------------------------------------------------------------------
# Wrapper
# ---------------------------------------------------------------------------
def upsample_group(route_head_nhwc, route_tail_nhwc, w_eff, b_eff,
                   *, compute_dtype=jnp.bfloat16):
    """route_head_nhwc: (N, H, W, Cin); route_tail_nhwc: (N, 2H, 2W, Ct).

    w_eff: (Cin, Cout) 1x1 conv weight with eval-BN scale folded in.
    b_eff: (1, Cout) folded eval-BN bias.
    Returns NHWC (N, 2H, 2W, Cout + Ct) in `compute_dtype`.
    """
    N, H, W, Cin = route_head_nhwc.shape
    Nt, H2, W2, Ct = route_tail_nhwc.shape
    Cout = w_eff.shape[1]
    assert Nt == N and H2 == 2 * H and W2 == 2 * W

    cdt = jnp.dtype(compute_dtype)
    isz = cdt.itemsize
    # Explicit single compute dtype for activations and weights (no silent
    # promotion inside the kernel); bias stays f32 (tiny, exact add).
    x = route_head_nhwc.astype(cdt)
    w = w_eff.astype(cdt)
    b = b_eff.astype(jnp.float32)

    target_bytes, vmem_limit = _tpu_budget()

    # Fused upsample+concat only when both channel counts are lane-aligned
    # (unmasked 128-lane stores); small channel counts fall back.
    fuse_tail = (Cout % 128 == 0) and (Ct % 128 == 0)
    # bf16 keeps the weight-duplication trick (lane-dense single store, the
    # doubled MXU work hides under HBM); fp32 avoids it (v5e MXU pressure).
    dup_weights = (not fuse_tail) and (isz < 4)

    if fuse_tail:
        C = Cout + Ct
        per_row = W * isz * (Cin + 4 * Ct + 4 * C)
        TH = _pick_tile_h(H, N, per_row, target_bytes)
        grid = (N, H // TH)
        # Free row-major reinterpretation: (N,2H,2W,Ct) -> (N,H,2,W,2*Ct).
        tail6 = route_tail_nhwc.astype(cdt).reshape(N, H, 2, W, 2 * Ct)

        out5 = pl.pallas_call(
            _upsample_concat_kernel,
            out_shape=jax.ShapeDtypeStruct((N, H, 2, W, 2 * C), cdt),
            grid=grid,
            in_specs=[
                pl.BlockSpec((1, TH, W, Cin), lambda n, r: (n, r, 0, 0)),
                pl.BlockSpec((Cin, Cout), lambda n, r: (0, 0)),
                pl.BlockSpec((1, Cout), lambda n, r: (0, 0)),
                pl.BlockSpec((1, TH, 2, W, 2 * Ct),
                             lambda n, r: (n, r, 0, 0, 0)),
            ],
            out_specs=pl.BlockSpec((1, TH, 2, W, 2 * C),
                                   lambda n, r: (n, r, 0, 0, 0)),
            compiler_params=pltpu.CompilerParams(
                dimension_semantics=("parallel", "parallel"),
                vmem_limit_bytes=vmem_limit,
            ),
            cost_estimate=pl.CostEstimate(
                flops=2 * N * H * W * Cin * Cout,
                transcendentals=0,
                bytes_accessed=(x.size + tail6.size + N * H * 2 * W * 2 * C) * isz
                               + w.size * isz + b.size * 4,
            ),
        )(x, w, b, tail6)
        # Free reinterpretation to the final NHWC tensor.
        return out5.reshape(N, 2 * H, 2 * W, C)

    # --- Fallback path: kernel = conv+BN+LReLU+2x upsample; channel concat
    # with route_tail is a pure memcpy, left to XLA. ---
    if dup_weights:
        w_k = jnp.concatenate([w, w], axis=1)     # (Cin, 2*Cout)
        b_k = jnp.concatenate([b, b], axis=1)     # (1, 2*Cout), f32
    else:
        w_k, b_k = w, b
    Cw = w_k.shape[1]

    per_row = W * isz * (Cin + 4 * Cout)
    TH = _pick_tile_h(H, N, per_row, target_bytes)
    grid = (N, H // TH)

    y5 = pl.pallas_call(
        _upsample_kernel,
        out_shape=jax.ShapeDtypeStruct((N, H, 2, W, 2 * Cout), cdt),
        grid=grid,
        in_specs=[
            pl.BlockSpec((1, TH, W, Cin), lambda n, r: (n, r, 0, 0)),
            pl.BlockSpec((Cin, Cw), lambda n, r: (0, 0)),
            pl.BlockSpec((1, Cw), lambda n, r: (0, 0)),
        ],
        out_specs=pl.BlockSpec((1, TH, 2, W, 2 * Cout),
                               lambda n, r: (n, r, 0, 0, 0)),
        compiler_params=pltpu.CompilerParams(
            dimension_semantics=("parallel", "parallel"),
            vmem_limit_bytes=vmem_limit,
        ),
        cost_estimate=pl.CostEstimate(
            flops=2 * N * H * W * Cin * Cw,
            transcendentals=0,
            bytes_accessed=(x.size + N * H * 2 * W * 2 * Cout) * isz
                           + w_k.size * isz + b_k.size * 4,
        ),
    )(x, w_k, b_k)

    y_up = y5.reshape(N, 2 * H, 2 * W, Cout)      # free reinterpretation
    return jnp.concatenate([y_up, route_tail_nhwc.astype(cdt)], axis=-1)


# ---------------------------------------------------------------------------
# Reference + self-test
# ---------------------------------------------------------------------------
def _reference(route_head, route_tail, w_eff, b_eff, compute_dtype):
    x = route_head.astype(compute_dtype).astype(jnp.float32)
    w = w_eff.astype(compute_dtype).astype(jnp.float32)
    y = jnp.einsum("nhwc,cd->nhwd", x, w,
                   precision=jax.lax.Precision.HIGHEST) + b_eff[0]
    y = jnp.maximum(y, 0.1 * y)
    y = jnp.repeat(jnp.repeat(y, 2, axis=1), 2, axis=2)
    t = route_tail.astype(compute_dtype).astype(jnp.float32)
    return jnp.concatenate([y, t], axis=-1)


def _make_case(key, N, Cin, Cout, Ct, H, W):
    k1, k2, k3, k4, k5, k6, k7 = jax.random.split(key, 7)
    route_head = jax.random.normal(k1, (N, H, W, Cin), jnp.float32)
    route_tail = jax.random.normal(k2, (N, 2 * H, 2 * W, Ct), jnp.float32)
    # Synthetic parameters (conv has no bias since bn=True in the module).
    conv_w = 0.1 * jax.random.normal(k3, (Cout, Cin), jnp.float32)   # 1x1 kernel
    bn_gamma = 1.0 + 0.1 * jax.random.normal(k4, (Cout,), jnp.float32)
    bn_beta = 0.1 * jax.random.normal(k5, (Cout,), jnp.float32)
    bn_mean = 0.1 * jax.random.normal(k6, (Cout,), jnp.float32)
    bn_var = jnp.abs(jax.random.normal(k7, (Cout,), jnp.float32)) + 0.5
    eps = 1e-5
    # Fold eval-mode BN into the conv: y = (x@W - mean)/sqrt(var+eps)*gamma + beta
    scale = bn_gamma / jnp.sqrt(bn_var + eps)                 # (Cout,)
    w_eff = conv_w.T * scale[None, :]                         # (Cin, Cout)
    b_eff = (bn_beta - bn_mean * scale)[None, :]              # (1, Cout)
    return route_head, route_tail, w_eff, b_eff


def _run_case(name, case, compute_dtype, atol, rtol):
    head, tail, w_eff, b_eff = case
    fn = jax.jit(functools.partial(upsample_group, compute_dtype=compute_dtype))
    out = jax.block_until_ready(fn(head, tail, w_eff, b_eff))
    N, H, W, _ = head.shape
    Cout = w_eff.shape[1]
    Ct = tail.shape[-1]
    assert out.shape == (N, 2 * H, 2 * W, Cout + Ct), (name, out.shape)
    ref = _reference(head, tail, w_eff, b_eff, compute_dtype)
    # Tolerance covers MXU precision / bf16 rounding; structural bugs (wrong
    # pixel/channel placement) would be O(1) errors.
    assert jnp.allclose(out.astype(jnp.float32), ref, rtol=rtol, atol=atol), \
        f"mismatch vs reference in case {name}"


if __name__ == "__main__":
    key = jax.random.PRNGKey(0)
    k_small, k_big = jax.random.split(key)

    # Small shapes consistent with the module: nin=4 -> conv to nin//2=2.
    # Small channel counts exercise the fallback (kernel + XLA concat) path,
    # in both fp32 (no weight dup) and bf16 (weight dup) variants.
    small = _make_case(k_small, N=2, Cin=4, Cout=2, Ct=2, H=16, W=16)
    _run_case("small_f32", small, jnp.float32, atol=5e-2, rtol=5e-2)
    _run_case("small_bf16", small, jnp.bfloat16, atol=5e-2, rtol=5e-2)

    # Lane-aligned channel counts exercise the fused upsample+concat kernel.
    fused = _make_case(k_big, N=1, Cin=256, Cout=128, Ct=128, H=8, W=8)
    _run_case("fused_bf16", fused, jnp.bfloat16, atol=5e-2, rtol=5e-2)

    print("KERNEL_OK")
</pallas_src>

<mosaic_0001>
module attributes {stable_mosaic.version = 11 : i64} {
  func.func @_upsample_kernel(%arg0: i32, %arg1: i32, %arg2: memref<1x4x16x4xf32, #tpu.memory_space<vmem>>, %arg3: memref<4x2xf32, #tpu.memory_space<vmem>>, %arg4: memref<1x2xf32, #tpu.memory_space<vmem>>, %arg5: memref<1x4x2x16x4xf32, #tpu.memory_space<vmem>>) attributes {dimension_semantics = [#tpu.dimension_semantics<parallel>, #tpu.dimension_semantics<parallel>], iteration_bounds = array<i64: 2, 4>, scalar_prefetch = 0 : i64, scratch_operands = 0 : i64, tpu.core_type = #tpu.core_type<tc>, window_params = [{transform_indices = @transform_0, window_bounds = array<i64: 1, 4, 16, 4>}, {pipeline_mode = #tpu.pipeline_mode<synchronous>, transform_indices = @transform_1, window_bounds = array<i64: 4, 2>}, {pipeline_mode = #tpu.pipeline_mode<synchronous>, transform_indices = @transform_2, window_bounds = array<i64: 1, 2>}, {transform_indices = @transform_3, window_bounds = array<i64: 1, 4, 2, 16, 4>}]} {
    %c0 = arith.constant 0 : index
    %c0_0 = arith.constant 0 : index
    %c0_1 = arith.constant 0 : index
    %c0_2 = arith.constant 0 : index
    %0 = vector.load %arg2[%c0, %c0_0, %c0_1, %c0_2] : memref<1x4x16x4xf32, #tpu.memory_space<vmem>>, vector<1x4x16x4xf32>
    %1 = vector.shape_cast %0 : vector<1x4x16x4xf32> to vector<64x4xf32>
    %c0_3 = arith.constant 0 : index
    %c0_4 = arith.constant 0 : index
    %2 = vector.load %arg3[%c0_3, %c0_4] : memref<4x2xf32, #tpu.memory_space<vmem>>, vector<4x2xf32>
    %cst = arith.constant dense<0.000000e+00> : vector<64x2xf32>
    %3 = tpu.matmul %1, %2, %cst {dimension_numbers = #tpu.dot_dimension_numbers<[1], [0], [0], [1], [0, 0, 1, 1], [], []>} : vector<64x4xf32>, vector<4x2xf32>, vector<64x2xf32> -> vector<64x2xf32>
    %c0_5 = arith.constant 0 : index
    %c0_6 = arith.constant 0 : index
    %4 = vector.load %arg4[%c0_5, %c0_6] : memref<1x2xf32, #tpu.memory_space<vmem>>, vector<1x2xf32>
    %5 = vector.broadcast %4 : vector<1x2xf32> to vector<64x2xf32>
    %6 = arith.addf %3, %5 : vector<64x2xf32>
    %cst_7 = arith.constant 1.000000e-01 : f32
    %7 = vector.broadcast %cst_7 : f32 to vector<64x2xf32>
    %8 = arith.mulf %7, %6 : vector<64x2xf32>
    %9 = arith.maximumf %6, %8 : vector<64x2xf32>
    %10 = vector.shape_cast %9 : vector<64x2xf32> to vector<4x16x2xf32>
    %c0_8 = arith.constant 0 : index
    %c0_9 = arith.constant 0 : index
    %c0_10 = arith.constant 0 : index
    %c0_11 = arith.constant 0 : index
    %c0_12 = arith.constant 0 : index
    %11 = vector.load %arg5[%c0_8, %c0_9, %c0_10, %c0_11, %c0_12] : memref<1x4x2x16x4xf32, #tpu.memory_space<vmem>>, vector<1x4x1x16x2xf32>
    %12 = vector.shape_cast %11 : vector<1x4x1x16x2xf32> to vector<4x16x2xf32>
    %13 = vector.shape_cast %10 : vector<4x16x2xf32> to vector<1x4x1x16x2xf32>
    tpu.vector_store %arg5[%c0_8, %c0_9, %c0_10, %c0_11, %c0_12], %13 {strides = array<i32>} : memref<1x4x2x16x4xf32, #tpu.memory_space<vmem>>, vector<1x4x1x16x2xf32>,
    %c0_13 = arith.constant 0 : index
    %c0_14 = arith.constant 0 : index
    %c0_15 = arith.constant 0 : index
    %c0_16 = arith.constant 0 : index
    %c2 = arith.constant 2 : index
    %14 = vector.load %arg5[%c0_13, %c0_14, %c0_15, %c0_16, %c2] : memref<1x4x2x16x4xf32, #tpu.memory_space<vmem>>, vector<1x4x1x16x2xf32>
    %15 = vector.shape_cast %14 : vector<1x4x1x16x2xf32> to vector<4x16x2xf32>
    %16 = vector.shape_cast %10 : vector<4x16x2xf32> to vector<1x4x1x16x2xf32>
    tpu.vector_store %arg5[%c0_13, %c0_14, %c0_15, %c0_16, %c2], %16 {strides = array<i32>} : memref<1x4x2x16x4xf32, #tpu.memory_space<vmem>>, vector<1x4x1x16x2xf32>,
    %c0_17 = arith.constant 0 : index
    %c0_18 = arith.constant 0 : index
    %c1 = arith.constant 1 : index
    %c0_19 = arith.constant 0 : index
    %c0_20 = arith.constant 0 : index
    %17 = vector.load %arg5[%c0_17, %c0_18, %c1, %c0_19, %c0_20] : memref<1x4x2x16x4xf32, #tpu.memory_space<vmem>>, vector<1x4x1x16x2xf32>
    %18 = vector.shape_cast %17 : vector<1x4x1x16x2xf32> to vector<4x16x2xf32>
    %19 = vector.shape_cast %10 : vector<4x16x2xf32> to vector<1x4x1x16x2xf32>
    tpu.vector_store %arg5[%c0_17, %c0_18, %c1, %c0_19, %c0_20], %19 {strides = array<i32>} : memref<1x4x2x16x4xf32, #tpu.memory_space<vmem>>, vector<1x4x1x16x2xf32>,
    %c0_21 = arith.constant 0 : index
    %c0_22 = arith.constant 0 : index
    %c1_23 = arith.constant 1 : index
    %c0_24 = arith.constant 0 : index
    %c2_25 = arith.constant 2 : index
    %20 = vector.load %arg5[%c0_21, %c0_22, %c1_23, %c0_24, %c2_25] : memref<1x4x2x16x4xf32, #tpu.memory_space<vmem>>, vector<1x4x1x16x2xf32>
    %21 = vector.shape_cast %20 : vector<1x4x1x16x2xf32> to vector<4x16x2xf32>
    %22 = vector.shape_cast %10 : vector<4x16x2xf32> to vector<1x4x1x16x2xf32>
    tpu.vector_store %arg5[%c0_21, %c0_22, %c1_23, %c0_24, %c2_25], %22 {strides = array<i32>} : memref<1x4x2x16x4xf32, #tpu.memory_space<vmem>>, vector<1x4x1x16x2xf32>,
    return
  }
  func.func @transform_0(%arg0: i32, %arg1: i32) -> (i32, i32, i32, i32) {
    %c0_i32 = arith.constant 0 : i32
    %c0_i32_0 = arith.constant 0 : i32
    %c0_i32_1 = arith.constant 0 : i32
    return %arg0, %arg1, %c0_i32, %c0_i32_0 : i32, i32, i32, i32
  }
  func.func @transform_1(%arg0: i32, %arg1: i32) -> (i32, i32) {
    %c0_i32 = arith.constant 0 : i32
    %c0_i32_0 = arith.constant 0 : i32
    %c0_i32_1 = arith.constant 0 : i32
    return %c0_i32, %c0_i32_0 : i32, i32
  }
  func.func @transform_2(%arg0: i32, %arg1: i32) -> (i32, i32) {
    %c0_i32 = arith.constant 0 : i32
    %c0_i32_0 = arith.constant 0 : i32
    %c0_i32_1 = arith.constant 0 : i32
    return %c0_i32, %c0_i32_0 : i32, i32
  }
  func.func @transform_3(%arg0: i32, %arg1: i32) -> (i32, i32, i32, i32, i32) {
    %c0_i32 = arith.constant 0 : i32
    %c0_i32_0 = arith.constant 0 : i32
    %c0_i32_1 = arith.constant 0 : i32
    %c0_i32_2 = arith.constant 0 : i32
    return %arg0, %arg1, %c0_i32, %c0_i32_0, %c0_i32_1 : i32, i32, i32, i32, i32
  }
}

</mosaic_0001>

<bundles_post_ra>
// kernel: upsample_group.1
= control target key start
LH: loop header
LB: loop body
LE: loop exit
PB: predicated region body
PF: predicated region fallthrough
CT: control target
= control target key end

     0   :  { %s626_s12 = smov 0   ;;  %s628_s13 = smov 0   ;;  %s768_s0 = inlined_call_operand.vmem [shape: f32[2,16,16,4], index: 0, kind: input, shape index: {}]   ;;  %s769_s1 = inlined_call_operand.vmem [shape: f32[4,2], index: 1, kind: input, shape index: {}]   ;;  %s770_s2 = inlined_call_operand.vmem [shape: f32[1,2], index: 2, kind: input, shape index: {}]   ;;  %s771_s3 = inlined_call_operand.vmem [shape: f32[2,16,2,16,4], index: 3, kind: output, shape index: {}]  }
   0x1   :  { %s630_s14 = smov 0   ;;  %s632_s15 = smov 0  }
   0x2   :  { %s634_s16 = smov 0  }
   0x3 LB: > { %s22_s17 = sadd.s32 1, %s595_s14  ;;  %s25_s18 = sadd.s32 1, %s599_s15  ;;  %s603_s16 = sphi %s634_s16, %s13_s16   ;;  %s599_s15 = sphi %s632_s15, %s775_s15   ;;  %s595_s14 = sphi %s630_s14, %s774_s14   ;;  %s591_s13 = sphi %s628_s13, %s773_s13   ;;  %s587_s12 = sphi %s626_s12, %s772_s12  }
   0x4   : > { %p23_p0 = scmp.ge.s32.totalorder %s22_s17, 4  ;;  %p484_p1 = scmp.ge.s32.totalorder %s603_s16, 1 }
   0x5   : > { %p159_p2 = scmp.lt.s32.totalorder %s603_s16, 9 }
   0x6   : > { %s777_s17 = smov (%p23_p0, %s22_s17), 0  ;;  %s779_s18 = smov (!%p23_p0, %s25_s18), %s599_s15 }
   0x7   : > { %p160_p3 = pnand %p484_p1, %p159_p2  ;;  %p27_p4 = scmp.ge.s32.totalorder %s779_s18, 2 }
   0x8   : > { %s485_s21 = sshll.u32 (!%p160_p3), %s587_s12, 2  ;;  %p194_p5 = scmp.lt.s32.totalorder (!%p160_p3), %s591_s13, 1 }
   0x9   : > { %s781_s18 = smov (%p27_p4, %s779_s18), 0  ;;  %163 = sbr.rel (%p160_p3) target bundleno = 288 (0x120), region = 32 }
   0xa   : > { %p196_p6 = scmp.lt.s32.totalorder (!%p160_p3), %s485_s21, 15  ;;  %s605_s11 = smov (!%p160_p3), 2  }
   0xe   : > { %v223_v0 = vld [vmem:[%s769_s1] sm:$0xf]  ;;  %vm253_vm0 = vcmask 1043456   ;;  %s783_s13 = smov (!%p194_p5, %s591_s13), 1  ;;  %s785_s21 = smov (!%p196_p6, %s485_s21), 15  ;;  %vm228_vm1 = vcmask 31744  }
   0xf   : > { %493 = vmatpush.msk.msra.mxu0 %vm253_vm0, %v223_v0  ;;  %520 = vmatpush.msk.msra.mxu1 %vm253_vm0, %v223_v0  ;;  %s487_s22 = sshll.u32 %s783_s13, 5  ;;  %s491_s23 = sshll.u32 %s783_s13, 6  ;;  %v564_v9 = vld [vmem:[%s770_s2] ss:$0 sm:$0xff]  ;;  %vm314_vm2 = vcmask 15360   ;;  %vm355_vm3 = vcmask 31760  }
  0x10   : > { %522 = vmatpush.msk.msra.mxu3 %vm253_vm0, %v223_v0  ;;  %521 = vmatpush.msk.msra.mxu2 %vm253_vm0, %v223_v0  ;;  %s486_s24 = sshll.u32 %s785_s21, 1  ;;  %s490_s25 = sshll.u32 %s785_s21, 2 }
  0x11   : > { %s200_s26 = sadd.s32 %s487_s22, %s486_s24  ;;  %s659_s27 = sadd.s32 %s491_s23, %s490_s25 }
  0x12   : > { %s488_s28 = sshll.u32 %s200_s26, 3  ;;  %s492_s7 = sshll.u32 %s659_s27, 3 }
  0x13   : > { %s202_s4 = scalar_lea.vmem %s768_s0, %s488_s28  ;;  %s679_s10 = scalar_lea.vmem %s771_s3, %s492_s7 }
  0x14   : > { %v215_v1 = vld [vmem:[%s202_s4] sm:$0xff]  ;;  %v217_v2 = vld [vmem:[%s202_s4 + $0x10] sm:$0xff]  ;;  %v216_v5 = vld [vmem:[%s202_s4 + $0x8] sm:$0xff] }
  0x15   : > { %v221_v3 = vld [vmem:[%s202_s4 + $0x30] sm:$0xff]  ;;  %494 = vmatmul.msk.f32.vlgmr.msra.gmra.mxu0 %vm228_vm1, %v215_v1  ;;  %496 = vmatmul.msk.f32.vlgmr.msra.gmra.mxu1 %vm228_vm1, %v217_v2  ;;  %v219_v4 = vld [vmem:[%s202_s4 + $0x20] sm:$0xff]  ;;  %v218_v6 = vld [vmem:[%s202_s4 + $0x18] sm:$0xff] }
  0x16   : > { %500 = vmatmul.msk.f32.vlgmr.msra.gmra.mxu3 %vm228_vm1, %v221_v3  ;;  %498 = vmatmul.msk.f32.vlgmr.msra.gmra.mxu2 %vm228_vm1, %v219_v4  ;;  %v222_v7 = vld [vmem:[%s202_s4 + $0x38] sm:$0xff]  ;;  %v220_v8 = vld [vmem:[%s202_s4 + $0x28] sm:$0xff] }
  0x1d   : > { %495 = vmatmul.msk.f32.gmra.mxu0 %vm228_vm1, %v216_v5  ;;  %497 = vmatmul.msk.f32.gmra.mxu1 %vm228_vm1, %v218_v6 }
  0x1e   : > { %501 = vmatmul.msk.f32.gmra.mxu3 %vm228_vm1, %v222_v7  ;;  %499 = vmatmul.msk.f32.gmra.mxu2 %vm228_vm1, %v220_v8 }
  0x92   : > { %v274_v10 = vpop.f32.mrf.mxu0  ;;  %v280_v11 = vpop.f32.mrf.mxu1 }
  0x93   : > { %v275_v12 = vadd.f32 %v564_v9, %v274_v10  ;;  %v281_v13 = vadd.f32 %v564_v9, %v280_v11 }
  0x95   : > { %v298_v14 = vmul.f32 0.1, %v275_v12  ;;  %v300_v15 = vmul.f32 0.1, %v281_v13 }
  0x97   : > { %v306_v16 = vmax.f32 %v275_v12, %v298_v14  ;;  %v308_v17 = vmax.f32 %v281_v13, %v300_v15 }
  0x99   : > { %315 = vst.msk [vmem:[%s679_s10] sm:$0xff] %vm314_vm2, %v306_v16  ;;  %v292_v18 = vpop.f32.mrf.mxu3  ;;  %335 = vrot.lane.b32.xlu1 %v308_v17, %s605_s11  ;;  %331 = vrot.lane.b32.xlu0 %v306_v16, %s605_s11  ;;  %v286_v24 = vpop.f32.mrf.mxu2 }
  0x9a   : > { %502 = vst.msk [vmem:[%s679_s10 + $0x10] sm:$0xff] %vm314_vm2, %v306_v16  ;;  %v293_v19 = vadd.f32 %v564_v9, %v292_v18  ;;  %v277_v20 = vpop.f32.mrf.mxu0  ;;  %v283_v21 = vpop.f32.mrf.mxu1  ;;  %v287_v26 = vadd.f32 %v564_v9, %v286_v24 }
  0x9b   : > { %317 = vst.msk [vmem:[%s679_s10 + $0x20] sm:$0xff] %vm314_vm2, %v308_v17  ;;  %v278_v22 = vadd.f32 %v564_v9, %v277_v20  ;;  %v284_v23 = vadd.f32 %v564_v9, %v283_v21 }
  0x9c   : > { %504 = vst.msk [vmem:[%s679_s10 + $0x30] sm:$0xff] %vm314_vm2, %v308_v17  ;;  %v304_v25 = vmul.f32 0.1, %v293_v19  ;;  %v302_v30 = vmul.f32 0.1, %v287_v26 }
  0x9d   : > { %v299_v27 = vmul.f32 0.1, %v278_v22  ;;  %v301_v28 = vmul.f32 0.1, %v284_v23 }
  0x9e   : > { %v312_v29 = vmax.f32 %v293_v19, %v304_v25  ;;  %v310_v33 = vmax.f32 %v287_v26, %v302_v30 }
  0x9f   : > { %v307_v31 = vmax.f32 %v278_v22, %v299_v27  ;;  %v309_v32 = vmax.f32 %v284_v23, %v301_v28 }
  0xa0   : > { %321 = vst.msk [vmem:[%s679_s10 + $0x60] sm:$0xff] %vm314_vm2, %v312_v29  ;;  %339 = vrot.lane.b32.xlu2 %v310_v33, %s605_s11 }
  0xa1   : > { %508 = vst.msk [vmem:[%s679_s10 + $0x70] sm:$0xff] %vm314_vm2, %v312_v29  ;;  %v295_v34 = vpop.f32.mrf.mxu3  ;;  %337 = vrot.lane.b32.xlu1 %v309_v32, %s605_s11  ;;  %333 = vrot.lane.b32.xlu0 %v307_v31, %s605_s11  ;;  %v289_v36 = vpop.f32.mrf.mxu2 }
  0xa2   : > { %316 = vst.msk [vmem:[%s679_s10 + $0x8] sm:$0xff] %vm314_vm2, %v307_v31  ;;  %v296_v35 = vadd.f32 %v564_v9, %v295_v34  ;;  %v290_v38 = vadd.f32 %v564_v9, %v289_v36 }
  0xa3   : > { %503 = vst.msk [vmem:[%s679_s10 + $0x18] sm:$0xff] %vm314_vm2, %v307_v31 }
  0xa4   : > { %318 = vst.msk [vmem:[%s679_s10 + $0x28] sm:$0xff] %vm314_vm2, %v309_v32  ;;  %v305_v37 = vmul.f32 0.1, %v296_v35  ;;  %v303_v40 = vmul.f32 0.1, %v290_v38 }
  0xa5   : > { %505 = vst.msk [vmem:[%s679_s10 + $0x38] sm:$0xff] %vm314_vm2, %v309_v32 }
  0xa6   : > { %v313_v39 = vmax.f32 %v296_v35, %v305_v37  ;;  %319 = vst.msk [vmem:[%s679_s10 + $0x40] sm:$0xff] %vm314_vm2, %v310_v33  ;;  %v311_v41 = vmax.f32 %v290_v38, %v303_v40 }
  0xa7   : > { %506 = vst.msk [vmem:[%s679_s10 + $0x50] sm:$0xff] %vm314_vm2, %v310_v33 }
  0xa8   : > { %322 = vst.msk [vmem:[%s679_s10 + $0x68] sm:$0xff] %vm314_vm2, %v313_v39  ;;  %341 = vrot.lane.b32.xlu2 %v311_v41, %s605_s11 }
  0xa9   : > { %509 = vst.msk [vmem:[%s679_s10 + $0x78] sm:$0xff] %vm314_vm2, %v313_v39  ;;  %345 = vrot.lane.b32.xlu1 %v313_v39, %s605_s11  ;;  %343 = vrot.lane.b32.xlu0 %v312_v29, %s605_s11 }
  0xaa   : > { %320 = vst.msk [vmem:[%s679_s10 + $0x48] sm:$0xff] %vm314_vm2, %v311_v41 }
  0xab   : > { %507 = vst.msk [vmem:[%s679_s10 + $0x58] sm:$0xff] %vm314_vm2, %v311_v41 }
  0xfa   : > { %v340_v42 = vpop.permute.xlu2 %339 }
  0xfb   : > { %360 = vst.msk [vmem:[%s679_s10 + $0x40] sm:$0xff] %vm355_vm3, %v340_v42 }
  0xfc   : > { %514 = vst.msk [vmem:[%s679_s10 + $0x50] sm:$0xff] %vm355_vm3, %v340_v42 }
 0x102   : > { %v342_v43 = vpop.permute.xlu2 %341 }
 0x103   : > { %361 = vst.msk [vmem:[%s679_s10 + $0x48] sm:$0xff] %vm355_vm3, %v342_v43 }
 0x104   : > { %515 = vst.msk [vmem:[%s679_s10 + $0x58] sm:$0xff] %vm355_vm3, %v342_v43 }
 0x10b   : > { %v336_v44 = vpop.permute.xlu1 %335  ;;  %v332_v45 = vpop.permute.xlu0 %331 }
 0x10c   : > { %358 = vst.msk [vmem:[%s679_s10 + $0x20] sm:$0xff] %vm355_vm3, %v336_v44 }
 0x10d   : > { %512 = vst.msk [vmem:[%s679_s10 + $0x30] sm:$0xff] %vm355_vm3, %v336_v44 }
 0x10e   : > { %356 = vst.msk [vmem:[%s679_s10] sm:$0xff] %vm355_vm3, %v332_v45 }
 0x10f   : > { %510 = vst.msk [vmem:[%s679_s10 + $0x10] sm:$0xff] %vm355_vm3, %v332_v45 }
 0x113   : > { %v338_v46 = vpop.permute.xlu1 %337  ;;  %v334_v47 = vpop.permute.xlu0 %333 }
 0x114   : > { %359 = vst.msk [vmem:[%s679_s10 + $0x28] sm:$0xff] %vm355_vm3, %v338_v46 }
 0x115   : > { %513 = vst.msk [vmem:[%s679_s10 + $0x38] sm:$0xff] %vm355_vm3, %v338_v46 }
 0x116   : > { %357 = vst.msk [vmem:[%s679_s10 + $0x8] sm:$0xff] %vm355_vm3, %v334_v47 }
 0x117   : > { %511 = vst.msk [vmem:[%s679_s10 + $0x18] sm:$0xff] %vm355_vm3, %v334_v47 }
 0x11b   : > { %v346_v48 = vpop.permute.xlu1 %345  ;;  %v344_v49 = vpop.permute.xlu0 %343 }
 0x11c   : > { %363 = vst.msk [vmem:[%s679_s10 + $0x68] sm:$0xff] %vm355_vm3, %v346_v48 }
 0x11d   : > { %517 = vst.msk [vmem:[%s679_s10 + $0x78] sm:$0xff] %vm355_vm3, %v346_v48 }
 0x11e   : > { %362 = vst.msk [vmem:[%s679_s10 + $0x60] sm:$0xff] %vm355_vm3, %v344_v49 }
 0x11f   : > { %516 = vst.msk [vmem:[%s679_s10 + $0x70] sm:$0xff] %vm355_vm3, %v344_v49 }
 0x120 PF: > { %s13_s16 = sadd.s32 1, %s603_s16   ;;  %s772_s12 = smov %s595_s14 }
 0x121   : > { %p10_p7 = scmp.ge.s32.totalorder %s13_s16, 10   ;;  %s773_s13 = smov %s599_s15 }
 0x122   : > { %s774_s14 = smov %s777_s17  ;;  %s775_s15 = smov %s781_s18 }
 0x123   :  { %12 = sbr.rel (!%p10_p7) target bundleno = 3 (0x3), region = 63 }

</bundles_post_ra>
